<compile_context>
chip_gen: v6e
topology: v6e:2x2x1
jax: 0.10.0
libtpu: 0.0.40
codegen_flags: <defaults>
</compile_context>

<pallas_src>
import functools

import jax
import jax.numpy as jnp
from jax import lax
from jax.experimental import pallas as pl
from jax.experimental.pallas import tpu as pltpu

EPS = 1e-10
_MIB = 1024 * 1024


def _phi(x):
    # elu(x) + 1 == where(x > 0, x + 1, exp(x))  (avoids the expm1 -> +1 trip).
    return jnp.where(x > 0, x + 1.0, jnp.exp(x))


def _vmem_capacity_bytes():
    """Generation-aware VMEM capacity (128 MiB v5e/v6e, 64 MiB per-TC v7x)."""
    try:
        cap = int(getattr(pltpu.get_tpu_info(), "vmem_capacity_bytes", 0))
        if cap > 0:
            return cap
    except Exception:
        pass
    return 64 * _MIB  # conservative default (v7x per-TC figure)


def _vmem_budgets():
    cap = _vmem_capacity_bytes()
    limit_cap = max(32 * _MIB, min(int(0.75 * cap), cap - 16 * _MIB))
    budget = int(0.6 * limit_cap)  # target working set for tile sizing
    return budget, limit_cap


def _vmem_limit(est, limit_cap):
    return int(min(max(2 * est, 32 * _MIB), limit_cap))


def _pick_tile(dim, max_tile, sublane_aligned=True):
    """Largest tile that divides `dim`, <= max_tile, multiple of 8 when tiling."""
    max_tile = max(1, int(max_tile))
    if dim <= max_tile:
        return dim
    for t in range(max_tile, 0, -1):
        if dim % t == 0 and (not sublane_aligned or t % 8 == 0):
            return t
    return dim  # full extent (always a legal block)


# ----------------------------------------------------------------------------
# Linear path, pass 1: KV / K-sum reduction over S.  grid = (N, S//TS).
# KV and K-sum accumulate directly in the resident (revisited) output blocks.
# ----------------------------------------------------------------------------
def _kv_reduce_kernel(k_ref, v_ref, kv_ref, ksum_ref, *, num_heads, qk_dim,
                      v_dim, mm_dtype):
    # k_ref: (TS, H*D)  v_ref: (TS, H*M)  kv_ref: (H, D, M) f32  ksum_ref: (H,1,D) f32
    s_idx = pl.program_id(1)

    @pl.when(s_idx == 0)
    def _init():
        kv_ref[...] = jnp.zeros_like(kv_ref)
        ksum_ref[...] = jnp.zeros_like(ksum_ref)

    # TODO(synk): for H >= 8 switch this static head loop to lax.fori_loop with
    # pl.multiple_of dynamic slices to bound live ranges.
    for h in range(num_heads):
        k_h = _phi(k_ref[:, pl.ds(h * qk_dim, qk_dim)].astype(jnp.float32))  # (TS,D)
        v_h = v_ref[:, pl.ds(h * v_dim, v_dim)]                              # (TS,M)
        # kv[h] += phi(k)_h^T @ v_h  -- dim-0 contraction, no materialised .T
        kv_ref[h] += lax.dot_general(
            k_h.astype(mm_dtype), v_h.astype(mm_dtype),
            dimension_numbers=(((0,), (0,)), ((), ())),
            preferred_element_type=jnp.float32)                              # (D,M)
        ksum_ref[h] += jnp.sum(k_h, axis=0, keepdims=True)                   # (1,D)


# ----------------------------------------------------------------------------
# Linear path, pass 2: out = phi(q) @ KV scaled by 1/denominator.
# grid = (N, L//TL), both axes parallel.
# ----------------------------------------------------------------------------
def _linear_finalize_kernel(q_ref, kv_ref, ksum_ref, o_ref, *, num_heads,
                            qk_dim, v_dim, eps, mm_dtype, approx_recip):
    # q_ref: (TL, H*D)  kv_ref: (H, D, M) f32  ksum_ref: (H, 1, D) f32
    # o_ref: (TL, H*M)
    outs = []
    # TODO(synk): when H*D, H*M <= ~512 evaluate a single block-diagonal KV
    # matmul to use the full 256-wide MXU instead of H small (TL,D)@(D,M) pushes.
    for h in range(num_heads):
        q_h = _phi(q_ref[:, pl.ds(h * qk_dim, qk_dim)].astype(jnp.float32))  # (TL,D)
        # Denominator on the VPU (broadcast-mul) + lane reduce; EUP reciprocal.
        denom = jnp.sum(q_h * ksum_ref[h], axis=-1, keepdims=True)           # (TL,1)
        z = pl.reciprocal(denom, approx=approx_recip) + eps                  # (TL,1)
        out_h = jnp.dot(q_h.astype(mm_dtype), kv_ref[h].astype(mm_dtype),
                        preferred_element_type=jnp.float32)                  # (TL,M)
        outs.append(out_h * z)
    # Single lane-dense (TL, H*M) store instead of per-head masked stores.
    o_ref[...] = jnp.concatenate(outs, axis=-1).astype(o_ref.dtype)


# ----------------------------------------------------------------------------
# Quadratic path (output_attention=True): grid = (N, L//TL).
# phi(k) is cached in VMEM at l==0 and reused for every L tile of the batch.
# ----------------------------------------------------------------------------
def _quadratic_attn_kernel(q_ref, k_ref, v_ref, o_ref, a_ref, phik_ref, *,
                           eps, num_heads, qk_dim, v_dim, mm_dtype):
    # q_ref: (TL, H*D)  k_ref: (S, H*D)  v_ref: (S, H*M)
    # o_ref: (TL, H*M)  a_ref: (H, TL, S)  phik_ref: (S, H*D) scratch (mm_dtype)
    l_idx = pl.program_id(1)

    @pl.when(l_idx == 0)
    def _cache_phik():
        # One EUP pass over the whole (S, H*D) slab per batch.
        phik_ref[...] = _phi(k_ref[...].astype(jnp.float32)).astype(phik_ref.dtype)

    outs = []
    for h in range(num_heads):
        q_h = _phi(q_ref[:, pl.ds(h * qk_dim, qk_dim)].astype(jnp.float32))  # (TL,D)
        k_h = phik_ref[:, pl.ds(h * qk_dim, qk_dim)]                          # (S,D)
        v_h = v_ref[:, pl.ds(h * v_dim, v_dim)]                               # (S,M)
        # QK = phi(q)_h @ phi(k)_h^T  (contract D; transposed RHS in-MXU).
        qk = lax.dot_general(
            q_h.astype(mm_dtype), k_h,
            dimension_numbers=(((1,), (1,)), ((), ())),
            preferred_element_type=jnp.float32)                               # (TL,S)
        a_h = qk / (jnp.sum(qk, axis=-1, keepdims=True) + eps)                # (TL,S)
        a_ref[h] = a_h.astype(a_ref.dtype)
        out_h = jnp.dot(a_h.astype(mm_dtype), v_h.astype(mm_dtype),
                        preferred_element_type=jnp.float32)                   # (TL,M)
        outs.append(out_h)
    o_ref[...] = jnp.concatenate(outs, axis=-1).astype(o_ref.dtype)


# ----------------------------------------------------------------------------
# Wrapper: pallas_call plumbing (reshapes only -- no HBM transposes).
# ----------------------------------------------------------------------------
def linear_attention(queries, keys, values, output_attention=False, eps=EPS,
                     max_l_tile=1024, max_s_tile=2048,
                     use_bf16_matmul=False, approx_reciprocal=True):
    N, L, H, D = queries.shape
    Nk, S, Hk, Dk = keys.shape
    Nv, Sv, Hv, M = values.shape
    assert (N, H, D) == (Nk, Hk, Dk) and (N, S, H) == (Nv, Sv, Hv)

    in_dtype = queries.dtype
    itemsize = jnp.dtype(in_dtype).itemsize
    mm_dtype = jnp.bfloat16 if use_bf16_matmul else in_dtype
    mm_itemsize = jnp.dtype(mm_dtype).itemsize

    budget, limit_cap = _vmem_budgets()

    # Fold heads into the minor (lane) dimension: pure reshapes, lane-dense I/O.
    q2 = queries.reshape(N, L, H * D)
    k2 = keys.reshape(N, S, H * D)
    v2 = values.reshape(N, S, H * M)

    if output_attention:
        # -------------------- quadratic path --------------------------------
        fixed = (2 * S * (H * D + H * M) * itemsize       # K/V blocks (x2 buffers)
                 + S * H * D * mm_itemsize)               # cached phi(k) scratch
        per_row = (2 * (H * D + H * M) * itemsize         # q + o blocks (x2)
                   + 2 * H * S * itemsize                 # A output block (x2)
                   + 2 * S * 4                            # qk + a_h f32 temporaries
                   + (H * D + H * M) * 4)                 # phi(q) + out f32 temporaries
        if budget > fixed:
            max_rows = max(8, (budget - fixed) // max(per_row, 1))
        else:
            # TODO(synk): tile S (two-pass row-sum normalizer) and/or use
            # pl.Buffered(1) on the K/V specs when full-S K/V overflows VMEM.
            max_rows = 8
        TL = _pick_tile(L, min(max_l_tile, max_rows))
        est = fixed + TL * per_row

        kernel = functools.partial(_quadratic_attn_kernel, eps=eps, num_heads=H,
                                   qk_dim=D, v_dim=M, mm_dtype=mm_dtype)
        v_out, a_out = pl.pallas_call(
            kernel,
            grid=(N, L // TL),
            in_specs=[
                pl.BlockSpec((None, TL, H * D), lambda n, l: (n, l, 0)),
                pl.BlockSpec((None, S, H * D), lambda n, l: (n, 0, 0)),
                pl.BlockSpec((None, S, H * M), lambda n, l: (n, 0, 0)),
            ],
            out_specs=(
                pl.BlockSpec((None, TL, H * M), lambda n, l: (n, l, 0)),
                pl.BlockSpec((None, H, TL, S), lambda n, l: (n, 0, l, 0)),
            ),
            out_shape=(
                jax.ShapeDtypeStruct((N, L, H * M), in_dtype),
                jax.ShapeDtypeStruct((N, H, L, S), in_dtype),
            ),
            scratch_shapes=[pltpu.VMEM((S, H * D), mm_dtype)],  # phi(k) cache
            # l axis must stay sequential ("arbitrary"): the phi(k) scratch is
            # filled at l==0 and reused by later l tiles of the same batch.
            compiler_params=pltpu.CompilerParams(
                dimension_semantics=("parallel", "arbitrary"),
                vmem_limit_bytes=_vmem_limit(est, limit_cap)),
        )(q2, k2, v2)
        return v_out.reshape(N, L, H, M), a_out

    # ------------------------ linear path (two passes) ----------------------
    # Pass 1: KV / K-sum reduction over S.  K/V are streamed exactly once.
    fixed1 = 2 * (H * D * M + H * D) * 4                  # kv + ksum out blocks (x2)
    per_row1 = 2 * (H * D + H * M) * itemsize + H * D * 4  # k,v blocks + phi(k) temp
    max_rows1 = max(8, (budget - fixed1) // max(per_row1, 1))
    TS = _pick_tile(S, min(max_s_tile, max_rows1))
    est1 = fixed1 + TS * per_row1

    kv_kernel = functools.partial(_kv_reduce_kernel, num_heads=H, qk_dim=D,
                                  v_dim=M, mm_dtype=mm_dtype)
    kv, ksum = pl.pallas_call(
        kv_kernel,
        grid=(N, S // TS),
        in_specs=[
            pl.BlockSpec((None, TS, H * D), lambda n, s: (n, s, 0)),
            pl.BlockSpec((None, TS, H * M), lambda n, s: (n, s, 0)),
        ],
        out_specs=(
            pl.BlockSpec((None, H, D, M), lambda n, s: (n, 0, 0, 0)),
            pl.BlockSpec((None, H, 1, D), lambda n, s: (n, 0, 0, 0)),
        ),
        out_shape=(
            jax.ShapeDtypeStruct((N, H, D, M), jnp.float32),
            jax.ShapeDtypeStruct((N, H, 1, D), jnp.float32),
        ),
        compiler_params=pltpu.CompilerParams(
            dimension_semantics=("parallel", "arbitrary"),
            vmem_limit_bytes=_vmem_limit(est1, limit_cap)),
    )(k2, v2)

    # Pass 2: phi(q) @ KV with per-head normalisation.
    fixed2 = 2 * (H * D * M + H * D) * 4                  # kv + ksum in blocks (x2)
    per_row2 = (2 * (H * D + H * M) * itemsize            # q + o blocks (x2)
                + (H * D + H * M) * 4)                    # phi(q) + out f32 temps
    max_rows2 = max(8, (budget - fixed2) // max(per_row2, 1))
    # With N==1, keep >=2 L tiles so both v7x TensorCores get work.
    mega_cap = L // 2 if (N == 1 and L >= 16) else L
    TL = _pick_tile(L, min(max_l_tile, max_rows2, mega_cap))
    est2 = fixed2 + TL * per_row2

    fin_kernel = functools.partial(_linear_finalize_kernel, num_heads=H,
                                   qk_dim=D, v_dim=M, eps=eps,
                                   mm_dtype=mm_dtype,
                                   approx_recip=approx_reciprocal)
    v_out = pl.pallas_call(
        fin_kernel,
        grid=(N, L // TL),
        in_specs=[
            pl.BlockSpec((None, TL, H * D), lambda n, l: (n, l, 0)),
            pl.BlockSpec((None, H, D, M), lambda n, l: (n, 0, 0, 0)),
            pl.BlockSpec((None, H, 1, D), lambda n, l: (n, 0, 0, 0)),
        ],
        out_specs=pl.BlockSpec((None, TL, H * M), lambda n, l: (n, l, 0)),
        out_shape=jax.ShapeDtypeStruct((N, L, H * M), in_dtype),
        compiler_params=pltpu.CompilerParams(
            dimension_semantics=("parallel", "parallel"),
            vmem_limit_bytes=_vmem_limit(est2, limit_cap)),
    )(q2, kv, ksum)
    return v_out.reshape(N, L, H, M), None


# ----------------------------------------------------------------------------
# Pure-JAX references (mirror the torch einsums exactly)
# ----------------------------------------------------------------------------
def _ref_linear(queries, keys, values, eps=EPS):
    Q = _phi(queries)
    K = _phi(keys)
    KV = jnp.einsum('nshd,nshm->nhmd', K, values)
    Z = 1.0 / jnp.einsum('nlhd,nhd->nlh', Q, K.sum(axis=1)) + eps
    V = jnp.einsum('nlhd,nhmd,nlh->nlhm', Q, KV, Z)
    return V


def _ref_quadratic(queries, keys, values, eps=EPS):
    Q = _phi(queries)
    K = _phi(keys)
    QK = jnp.einsum('nlhe,nshe->nhls', Q, K)
    A = QK / (jnp.sum(QK, axis=-1, keepdims=True) + eps)
    V = jnp.einsum('nhls,nshd->nlhd', A, values)
    return V, A


if __name__ == "__main__":
    key = jax.random.PRNGKey(0)
    kq, kk, kv = jax.random.split(key, 3)

    # Small shapes: batch=2, seq L=S=8, heads=2, qk-dim=4, v-dim=4.
    N, L, S, H, D, M = 2, 8, 8, 2, 4, 4
    queries = jax.random.normal(kq, (N, L, H, D), dtype=jnp.float32)
    keys = jax.random.normal(kk, (N, S, H, D), dtype=jnp.float32)
    values = jax.random.normal(kv, (N, S, H, M), dtype=jnp.float32)

    v_lin_ref = _ref_linear(queries, keys, values)

    # Linear path, default (approx EUP reciprocal) -> looser tolerance.
    v_lin, a_lin = linear_attention(queries, keys, values, output_attention=False)
    v_lin = jax.block_until_ready(v_lin)
    assert a_lin is None
    assert jnp.allclose(v_lin, v_lin_ref, atol=1e-2, rtol=1e-2), \
        "linear path (approx reciprocal) mismatch"

    # Linear path, exact reciprocal -> tight tolerance.
    v_lin_exact, _ = linear_attention(queries, keys, values,
                                      output_attention=False,
                                      approx_reciprocal=False)
    v_lin_exact = jax.block_until_ready(v_lin_exact)
    assert jnp.allclose(v_lin_exact, v_lin_ref, atol=2e-5, rtol=2e-5), \
        "linear path (exact) mismatch"

    # Quadratic (output_attention=True) path.
    v_q, a_q = linear_attention(queries, keys, values, output_attention=True)
    v_q, a_q = jax.block_until_ready((v_q, a_q))
    v_q_ref, a_q_ref = _ref_quadratic(queries, keys, values)
    assert jnp.allclose(v_q, v_q_ref, atol=2e-5, rtol=2e-5), "quadratic V mismatch"
    assert jnp.allclose(a_q, a_q_ref, atol=2e-5, rtol=2e-5), "quadratic A mismatch"

    # Exercise the multi-tile grids (L/S tiling, S accumulation across tiles,
    # phi(k) cache reuse across L tiles, megacore TL cap for N==1).
    N2, L2, S2, H2, D2, M2 = 1, 32, 32, 2, 4, 4
    k2a, k2b, k2c = jax.random.split(jax.random.PRNGKey(1), 3)
    q2 = jax.random.normal(k2a, (N2, L2, H2, D2), dtype=jnp.float32)
    kk2 = jax.random.normal(k2b, (N2, S2, H2, D2), dtype=jnp.float32)
    vv2 = jax.random.normal(k2c, (N2, S2, H2, M2), dtype=jnp.float32)

    v_lin2, _ = linear_attention(q2, kk2, vv2, output_attention=False,
                                 max_l_tile=8, max_s_tile=8,
                                 approx_reciprocal=False)
    v_lin2 = jax.block_until_ready(v_lin2)
    assert jnp.allclose(v_lin2, _ref_linear(q2, kk2, vv2), atol=2e-5, rtol=2e-5), \
        "tiled linear path mismatch"

    v_q2, a_q2 = linear_attention(q2, kk2, vv2, output_attention=True,
                                  max_l_tile=8)
    v_q2, a_q2 = jax.block_until_ready((v_q2, a_q2))
    v_q2r, a_q2r = _ref_quadratic(q2, kk2, vv2)
    assert jnp.allclose(v_q2, v_q2r, atol=2e-5, rtol=2e-5), "tiled quadratic V mismatch"
    assert jnp.allclose(a_q2, a_q2r, atol=2e-5, rtol=2e-5), "tiled quadratic A mismatch"

    print("KERNEL_OK")
</pallas_src>

<mosaic_0001>
module attributes {stable_mosaic.version = 11 : i64} {
  func.func @_kv_reduce_kernel(%arg0: i32, %arg1: i32, %arg2: memref<1x8x8xf32, #tpu.memory_space<vmem>>, %arg3: memref<1x8x8xf32, #tpu.memory_space<vmem>>, %arg4: memref<1x2x4x4xf32, #tpu.memory_space<vmem>>, %arg5: memref<1x2x1x4xf32, #tpu.memory_space<vmem>>) attributes {dimension_semantics = [#tpu.dimension_semantics<parallel>, #tpu.dimension_semantics<arbitrary>], iteration_bounds = array<i64: 2, 1>, scalar_prefetch = 0 : i64, scratch_operands = 0 : i64, tpu.core_type = #tpu.core_type<tc>, window_params = [{transform_indices = @transform_0, window_bounds = array<i64: 1, 8, 8>}, {transform_indices = @transform_1, window_bounds = array<i64: 1, 8, 8>}, {transform_indices = @transform_2, window_bounds = array<i64: 1, 2, 4, 4>}, {transform_indices = @transform_3, window_bounds = array<i64: 1, 2, 1, 4>}]} {
    %c0_i32 = arith.constant 0 : i32
    %0 = arith.cmpi eq, %arg1, %c0_i32 : i32
    %1 = arith.extui %0 : i1 to i32
    %c0_i32_0 = arith.constant 0 : i32
    %2 = arith.cmpi ne, %1, %c0_i32_0 : i32
    scf.if %2 {
      %cst_49 = arith.constant 0.000000e+00 : f32
      %53 = vector.broadcast %cst_49 : f32 to vector<2x4x4xf32>
      %c0_50 = arith.constant 0 : index
      %c0_51 = arith.constant 0 : index
      %c0_52 = arith.constant 0 : index
      %c0_53 = arith.constant 0 : index
      %54 = vector.load %arg4[%c0_50, %c0_51, %c0_52, %c0_53] : memref<1x2x4x4xf32, #tpu.memory_space<vmem>>, vector<1x2x4x4xf32>
      %55 = vector.shape_cast %54 : vector<1x2x4x4xf32> to vector<2x4x4xf32>
      %56 = vector.shape_cast %53 : vector<2x4x4xf32> to vector<1x2x4x4xf32>
      tpu.vector_store %arg4[%c0_50, %c0_51, %c0_52, %c0_53], %56 {strides = array<i32>} : memref<1x2x4x4xf32, #tpu.memory_space<vmem>>, vector<1x2x4x4xf32>,
      %cst_54 = arith.constant 0.000000e+00 : f32
      %57 = vector.broadcast %cst_54 : f32 to vector<2x1x4xf32>
      %c0_55 = arith.constant 0 : index
      %c0_56 = arith.constant 0 : index
      %c0_57 = arith.constant 0 : index
      %c0_58 = arith.constant 0 : index
      %58 = vector.load %arg5[%c0_55, %c0_56, %c0_57, %c0_58] : memref<1x2x1x4xf32, #tpu.memory_space<vmem>>, vector<1x2x1x4xf32>
      %59 = vector.shape_cast %58 : vector<1x2x1x4xf32> to vector<2x1x4xf32>
      %60 = vector.shape_cast %57 : vector<2x1x4xf32> to vector<1x2x1x4xf32>
      tpu.vector_store %arg5[%c0_55, %c0_56, %c0_57, %c0_58], %60 {strides = array<i32>} : memref<1x2x1x4xf32, #tpu.memory_space<vmem>>, vector<1x2x1x4xf32>,
    } else {
    }
    %c0 = arith.constant 0 : index
    %c0_1 = arith.constant 0 : index
    %c0_2 = arith.constant 0 : index
    %3 = vector.load %arg2[%c0, %c0_1, %c0_2] : memref<1x8x8xf32, #tpu.memory_space<vmem>>, vector<1x8x4xf32>
    %4 = vector.shape_cast %3 : vector<1x8x4xf32> to vector<8x4xf32>
    %cst = arith.constant 0.000000e+00 : f32
    %5 = vector.broadcast %cst : f32 to vector<8x4xf32>
    %6 = arith.cmpf ogt, %4, %5 : vector<8x4xf32>
    %cst_3 = arith.constant 1.000000e+00 : f32
    %7 = vector.broadcast %cst_3 : f32 to vector<8x4xf32>
    %8 = arith.addf %4, %7 : vector<8x4xf32>
    %9 = math.exp %4 : vector<8x4xf32>
    %10 = arith.select %6, %8, %9 : vector<8x4xi1>, vector<8x4xf32>
    %c0_4 = arith.constant 0 : index
    %c0_5 = arith.constant 0 : index
    %c0_6 = arith.constant 0 : index
    %11 = vector.load %arg3[%c0_4, %c0_5, %c0_6] : memref<1x8x8xf32, #tpu.memory_space<vmem>>, vector<1x8x4xf32>
    %12 = vector.shape_cast %11 : vector<1x8x4xf32> to vector<8x4xf32>
    %c0_7 = arith.constant 0 : index
    %c0_8 = arith.constant 0 : index
    %c0_9 = arith.constant 0 : index
    %c0_10 = arith.constant 0 : index
    %13 = vector.load %arg4[%c0_7, %c0_8, %c0_9, %c0_10] : memref<1x2x4x4xf32, #tpu.memory_space<vmem>>, vector<1x1x4x4xf32>
    %14 = vector.shape_cast %13 : vector<1x1x4x4xf32> to vector<4x4xf32>
    %cst_11 = arith.constant dense<0.000000e+00> : vector<4x4xf32>
    %15 = tpu.matmul %10, %12, %cst_11 {dimension_numbers = #tpu.dot_dimension_numbers<[0], [0], [1], [1], [0, 1, 1, 1], [], []>} : vector<8x4xf32>, vector<8x4xf32>, vector<4x4xf32> -> vector<4x4xf32>
    %16 = arith.addf %14, %15 : vector<4x4xf32>
    %c0_12 = arith.constant 0 : index
    %c0_13 = arith.constant 0 : index
    %c0_14 = arith.constant 0 : index
    %c0_15 = arith.constant 0 : index
    %17 = vector.load %arg4[%c0_12, %c0_13, %c0_14, %c0_15] : memref<1x2x4x4xf32, #tpu.memory_space<vmem>>, vector<1x1x4x4xf32>
    %18 = vector.shape_cast %17 : vector<1x1x4x4xf32> to vector<4x4xf32>
    %19 = vector.shape_cast %16 : vector<4x4xf32> to vector<1x1x4x4xf32>
    tpu.vector_store %arg4[%c0_12, %c0_13, %c0_14, %c0_15], %19 {strides = array<i32>} : memref<1x2x4x4xf32, #tpu.memory_space<vmem>>, vector<1x1x4x4xf32>,
    %c0_16 = arith.constant 0 : index
    %c0_17 = arith.constant 0 : index
    %c0_18 = arith.constant 0 : index
    %c0_19 = arith.constant 0 : index
    %20 = vector.load %arg5[%c0_16, %c0_17, %c0_18, %c0_19] : memref<1x2x1x4xf32, #tpu.memory_space<vmem>>, vector<1x1x1x4xf32>
    %21 = vector.shape_cast %20 : vector<1x1x1x4xf32> to vector<1x4xf32>
    %cst_20 = arith.constant dense<0.000000e+00> : vector<4xf32>
    %22 = vector.multi_reduction <add>, %10, %cst_20 [0] : vector<8x4xf32> to vector<4xf32>
    %23 = vector.shape_cast %22 : vector<4xf32> to vector<1x4xf32>
    %24 = arith.addf %21, %23 : vector<1x4xf32>
    %c0_21 = arith.constant 0 : index
    %c0_22 = arith.constant 0 : index
    %c0_23 = arith.constant 0 : index
    %c0_24 = arith.constant 0 : index
    %25 = vector.load %arg5[%c0_21, %c0_22, %c0_23, %c0_24] : memref<1x2x1x4xf32, #tpu.memory_space<vmem>>, vector<1x1x1x4xf32>
    %26 = vector.shape_cast %25 : vector<1x1x1x4xf32> to vector<1x4xf32>
    %27 = vector.shape_cast %24 : vector<1x4xf32> to vector<1x1x1x4xf32>
    tpu.vector_store %arg5[%c0_21, %c0_22, %c0_23, %c0_24], %27 {strides = array<i32>} : memref<1x2x1x4xf32, #tpu.memory_space<vmem>>, vector<1x1x1x4xf32>,
    %c0_25 = arith.constant 0 : index
    %c0_26 = arith.constant 0 : index
    %c4 = arith.constant 4 : index
    %28 = vector.load %arg2[%c0_25, %c0_26, %c4] : memref<1x8x8xf32, #tpu.memory_space<vmem>>, vector<1x8x4xf32>
    %29 = vector.shape_cast %28 : vector<1x8x4xf32> to vector<8x4xf32>
    %cst_27 = arith.constant 0.000000e+00 : f32
    %30 = vector.broadcast %cst_27 : f32 to vector<8x4xf32>
    %31 = arith.cmpf ogt, %29, %30 : vector<8x4xf32>
    %cst_28 = arith.constant 1.000000e+00 : f32
    %32 = vector.broadcast %cst_28 : f32 to vector<8x4xf32>
    %33 = arith.addf %29, %32 : vector<8x4xf32>
    %34 = math.exp %29 : vector<8x4xf32>
    %35 = arith.select %31, %33, %34 : vector<8x4xi1>, vector<8x4xf32>
    %c0_29 = arith.constant 0 : index
    %c0_30 = arith.constant 0 : index
    %c4_31 = arith.constant 4 : index
    %36 = vector.load %arg3[%c0_29, %c0_30, %c4_31] : memref<1x8x8xf32, #tpu.memory_space<vmem>>, vector<1x8x4xf32>
    %37 = vector.shape_cast %36 : vector<1x8x4xf32> to vector<8x4xf32>
    %c0_32 = arith.constant 0 : index
    %c1 = arith.constant 1 : index
    %c0_33 = arith.constant 0 : index
    %c0_34 = arith.constant 0 : index
    %38 = vector.load %arg4[%c0_32, %c1, %c0_33, %c0_34] : memref<1x2x4x4xf32, #tpu.memory_space<vmem>>, vector<1x1x4x4xf32>
    %39 = vector.shape_cast %38 : vector<1x1x4x4xf32> to vector<4x4xf32>
    %cst_35 = arith.constant dense<0.000000e+00> : vector<4x4xf32>
    %40 = tpu.matmul %35, %37, %cst_35 {dimension_numbers = #tpu.dot_dimension_numbers<[0], [0], [1], [1], [0, 1, 1, 1], [], []>} : vector<8x4xf32>, vector<8x4xf32>, vector<4x4xf32> -> vector<4x4xf32>
    %41 = arith.addf %39, %40 : vector<4x4xf32>
    %c0_36 = arith.constant 0 : index
    %c1_37 = arith.constant 1 : index
    %c0_38 = arith.constant 0 : index
    %c0_39 = arith.constant 0 : index
    %42 = vector.load %arg4[%c0_36, %c1_37, %c0_38, %c0_39] : memref<1x2x4x4xf32, #tpu.memory_space<vmem>>, vector<1x1x4x4xf32>
    %43 = vector.shape_cast %42 : vector<1x1x4x4xf32> to vector<4x4xf32>
    %44 = vector.shape_cast %41 : vector<4x4xf32> to vector<1x1x4x4xf32>
    tpu.vector_store %arg4[%c0_36, %c1_37, %c0_38, %c0_39], %44 {strides = array<i32>} : memref<1x2x4x4xf32, #tpu.memory_space<vmem>>, vector<1x1x4x4xf32>,
    %c0_40 = arith.constant 0 : index
    %c1_41 = arith.constant 1 : index
    %c0_42 = arith.constant 0 : index
    %c0_43 = arith.constant 0 : index
    %45 = vector.load %arg5[%c0_40, %c1_41, %c0_42, %c0_43] : memref<1x2x1x4xf32, #tpu.memory_space<vmem>>, vector<1x1x1x4xf32>
    %46 = vector.shape_cast %45 : vector<1x1x1x4xf32> to vector<1x4xf32>
    %cst_44 = arith.constant dense<0.000000e+00> : vector<4xf32>
    %47 = vector.multi_reduction <add>, %35, %cst_44 [0] : vector<8x4xf32> to vector<4xf32>
    %48 = vector.shape_cast %47 : vector<4xf32> to vector<1x4xf32>
    %49 = arith.addf %46, %48 : vector<1x4xf32>
    %c0_45 = arith.constant 0 : index
    %c1_46 = arith.constant 1 : index
    %c0_47 = arith.constant 0 : index
    %c0_48 = arith.constant 0 : index
    %50 = vector.load %arg5[%c0_45, %c1_46, %c0_47, %c0_48] : memref<1x2x1x4xf32, #tpu.memory_space<vmem>>, vector<1x1x1x4xf32>
    %51 = vector.shape_cast %50 : vector<1x1x1x4xf32> to vector<1x4xf32>
    %52 = vector.shape_cast %49 : vector<1x4xf32> to vector<1x1x1x4xf32>
    tpu.vector_store %arg5[%c0_45, %c1_46, %c0_47, %c0_48], %52 {strides = array<i32>} : memref<1x2x1x4xf32, #tpu.memory_space<vmem>>, vector<1x1x1x4xf32>,
    return
  }
  func.func @transform_0(%arg0: i32, %arg1: i32) -> (i32, i32, i32) {
    %c0_i32 = arith.constant 0 : i32
    %c0_i32_0 = arith.constant 0 : i32
    return %arg0, %arg1, %c0_i32 : i32, i32, i32
  }
  func.func @transform_1(%arg0: i32, %arg1: i32) -> (i32, i32, i32) {
    %c0_i32 = arith.constant 0 : i32
    %c0_i32_0 = arith.constant 0 : i32
    return %arg0, %arg1, %c0_i32 : i32, i32, i32
  }
  func.func @transform_2(%arg0: i32, %arg1: i32) -> (i32, i32, i32, i32) {
    %c0_i32 = arith.constant 0 : i32
    %c0_i32_0 = arith.constant 0 : i32
    %c0_i32_1 = arith.constant 0 : i32
    %c0_i32_2 = arith.constant 0 : i32
    return %arg0, %c0_i32, %c0_i32_0, %c0_i32_1 : i32, i32, i32, i32
  }
  func.func @transform_3(%arg0: i32, %arg1: i32) -> (i32, i32, i32, i32) {
    %c0_i32 = arith.constant 0 : i32
    %c0_i32_0 = arith.constant 0 : i32
    %c0_i32_1 = arith.constant 0 : i32
    %c0_i32_2 = arith.constant 0 : i32
    return %arg0, %c0_i32, %c0_i32_0, %c0_i32_1 : i32, i32, i32, i32
  }
}

</mosaic_0001>

<bundles_post_ra>
// kernel: tpu_custom_call.1
= control target key start
LH: loop header
LB: loop body
LE: loop exit
PB: predicated region body
PF: predicated region fallthrough
CT: control target
= control target key end

     0   :  { %9 = vsyncpa [#allocation3], 0  ;;  %s1288_s0 = inlined_call_operand.hbm [shape: f32[2,8,8], index: 0, kind: input, shape index: {}]   ;;  %s1289_s1 = inlined_call_operand.hbm [shape: f32[2,8,8], index: 1, kind: input, shape index: {}]   ;;  %s1290_s2 = inlined_call_operand.hbm [shape: f32[2,2,4,4], index: 2, kind: output, shape index: {0}]   ;;  %s1291_s3 = inlined_call_operand.hbm [shape: f32[2,2,1,4], index: 3, kind: output, shape index: {1}]  }
   0x1   :  { %11 = vsyncpa [#allocation3 + $0x1], 0 }
   0x2   :  { %12 = vsyncpa [#allocation6], 0 }
   0x3   :  { %14 = vsyncpa [#allocation6 + $0x1], 0 }
   0x4   :  { %15 = vsyncpa [#allocation4], 0 }
   0x5   :  { %17 = vsyncpa [#allocation4 + $0x1], 0 }
   0x6   :  { %18 = vsyncpa [#allocation9], 0 }
   0x7   :  { %20 = vsyncpa [#allocation9 + $0x1], 0  ;;  %s1047_s12 = smov 0   ;;  %s1049_s13 = smov 0  }
   0x8   :  { %s1051_s14 = smov 0   ;;  %s1053_s15 = smov 0  }
   0x9   :  { %s1055_s16 = smov 0   ;;  %s1057_s17 = smov 0  }
   0xa LB: > { %s718_s18 = sadd.s32 4294967295, %s1013_s17   ;;  %s719_s19 = sadd.s32 4294967294, %s1013_s17   ;;  %s1013_s17 = sphi %s1057_s17, %s26_s17   ;;  %s1009_s16 = sphi %s1055_s16, %s1303_s16   ;;  %s1005_s15 = sphi %s1053_s15, %s1302_s15   ;;  %s1001_s14 = sphi %s1051_s14, %s1301_s14   ;;  %s997_s13 = sphi %s1049_s13, %s1300_s13   ;;  %s993_s12 = sphi %s1047_s12, %s1299_s12  }
   0xb   : > { %s38_s20 = sadd.s32 1, %s1009_s16  ;;  %s47_s21 = sadd.s32 1, %s1001_s14 }
   0xc   : > { %p40_p0 = scmp.ge.s32.totalorder %s38_s20, 2  ;;  %p54_p1 = scmp.ne.s32.totalorder %s1001_s14, %s997_s13 }
   0xd   : > { %p55_p2 = scmp.eq.s32.totalorder %s1013_s17, 0  ;;  %p60_p3 = scmp.ne.s32.totalorder %s997_s13, %s993_s12 }
   0xe   : > { %s1305_s20 = smov (%p40_p0, %s38_s20), 0  ;;  %p61_p5 = scmp.eq.s32.totalorder %s718_s18, 0 }
   0xf   : > { %p1088_p4 = por %p55_p2, %p54_p1  ;;  %s42_s23 = ssub.s32 %s1009_s16, %s1305_s20 }
  0x10   : > { %p112_p6 = scmp.eq.s32.totalorder %s718_s18, 1  ;;  %p45_p7 = scmp.eq.s32.totalorder %s42_s23, 0 }
  0x11   : > { %p1094_p8 = por %p61_p5, %p60_p3  ;;  %p118_p10 = scmp.eq.s32.totalorder %s719_s19, 1 }
  0x12   : > { %p1098_p9 = por %p112_p6, %p54_p1  ;;  %p783_p13 = scmp.lt.s32.totalorder %s1013_s17, 2 }
  0x13   : > { %s1103_s26 = scalar_select %p45_p7, %s1001_s14, %s47_s21  }
  0x14   : > { %p1105_p11 = por %p118_p10, %p60_p3  ;;  %s1112_s28 = sand.u32 1, %s1001_s14  }
  0x15   : > { %s722_s29 = sshll.u32 %s1112_s28, 3  ;;  %s723_s30 = sshll.u32 %s1009_s16, 7 }
  0x16   : > { %s174_s6 = scalar_lea.hbm %s1288_s0, %s723_s30  ;;  %s168_s7 = scalar_lea.vmem [#allocation2], %s722_s29 }
  0x17   : > { %s176_s8 = sshll.u32 %s168_s7, 4  ;;  %p1121_p0 = pnand %p783_p13, %p1088_p4  ;;  %s177_s8 = int_to_ptr.vmem [resolvable:$true] %s176_s8 }
  0x18   : > { %p726_p1 = scmp.ge.s32.totalorder %s1013_s17, 1  ;;  %p200_p2 = scmp.lt.s32.totalorder %s1013_s17, 3 }
  0x19   : > { %s165_s10 = scalar_lea.sflag [#allocation3], %s1112_s28  ;;  %p845_p3 = pneg %p1121_p0 }
  0x1a   : > { %s856_s11 = scalar_lea.vmem %s177_s8, 128  ;;  %s1015_s18 = smov [#allocation2]  }
  0x1b   : > { %p857_p5 = scmp.ne.s32.totalorder %s177_s8, %s856_s11  ;;  %s861_s19 = sshll.u32 %s1015_s18, 4  ;;  %s862_s19 = int_to_ptr.vmem [resolvable:$false] %s861_s19 }
  0x1c   : > { %s863_s21 = scalar_lea.vmem %s862_s19, 256  ;;  %p864_p4 = scmp.lt.s32.totalorder %s177_s8, %s862_s19 }
  0x1d   : > { %p859_p6 = pnand %p857_p5, %p845_p3  ;;  %p865_p10 = scmp.lt.s32.totalorder %s863_s21, %s856_s11 }
  0x1f   : > { %p860_p7 = pneg %p859_p6  ;;  %p866_p13 = por %p865_p10, %p864_p4 }
  0x21   : > { %p867_p12 = pnand %p866_p13, %p860_p7 }
  0x23   : > { %870 = shalt.err (!%p867_p12)
}
  0x24   : > { %772 = dma.hbm_to_vmem [thread:$0]  (!%p1121_p0), %s174_s6, 128, %s177_s8, %s165_s10  }
  0x25   : > { %p1139_p5 = pnand %p726_p1, %p200_p2  ;;  %s193_s5 = scalar_lea.hbm %s1289_s1, %s723_s30 }
  0x26   : > { %s187_s7 = scalar_lea.vmem [#allocation5], %s722_s29  ;;  %s184_s18 = scalar_lea.sflag [#allocation6], %s1112_s28 }
  0x27   : > { %s195_s11 = sshll.u32 %s187_s7, 4  ;;  %s1016_s6 = smov [#allocation5]   ;;  %s196_s11 = int_to_ptr.vmem [resolvable:$true] %s195_s11 }
  0x28   : > { %s884_s19 = scalar_lea.vmem %s196_s11, 128  ;;  %s889_s8 = sshll.u32 %s1016_s6, 4  ;;  %s890_s8 = int_to_ptr.vmem [resolvable:$false] %s889_s8 }
  0x29   : > { %p885_p12 = scmp.ne.s32.totalorder %s196_s11, %s884_s19  ;;  %s891_s10 = scalar_lea.vmem %s890_s8, 256 }
  0x2a   : > { %p892_p1 = scmp.lt.s32.totalorder %s196_s11, %s890_s8  ;;  %p893_p2 = scmp.lt.s32.totalorder %s891_s10, %s884_s19 }
  0x2b   : > { %p887_p6 = pnand %p885_p12, %p845_p3 }
  0x2c   : > { %p894_p4 = por %p893_p2, %p892_p1 }
  0x2d   : > { %p888_p7 = pneg %p887_p6 }
  0x2f   : > { %p895_p10 = pnand %p894_p4, %p888_p7 }
  0x31   : > { %898 = shalt.err (!%p895_p10)
}
  0x32   : > { %775 = dma.hbm_to_vmem [thread:$0]  (!%p1121_p0), %s193_s5, 128, %s196_s11, %s184_s18  }
  0x33   : > { %204 = sbr.rel (%p1139_p5) target bundleno = 526 (0x20e), region = 28  ;;  %s1155_s28 = sand.u32 (!%p1139_p5), 1, %s997_s13  }
  0x34   : > { %s1158_s29 = sshll.u32 (!%p1139_p5), %s1155_s28, 3  ;;  %s207_s30 = scalar_lea.sflag (!%p1139_p5), [#allocation3], %s1155_s28 }
  0x35   : > { %s210_s21 = scalar_lea.vmem (!%p1139_p5), [#allocation2], %s1158_s29 }
  0x38   : > { %976 = dma.done.wait (%p1094_p8), %s207_s30, 128  }
  0x39   : > { %978 = vsyncadd (%p1094_p8), %s207_s30, 4294967168  ;;  %s216_s9 = scalar_lea.sflag [#allocation6], %s1155_s28  ;;  %s219_s22 = scalar_lea.vmem [#allocation5], %s1158_s29 }
  0x3a   : > { %980 = dma.done.wait (%p1094_p8), %s216_s9, 128  }
  0x3b   : > { %982 = vsyncadd (%p1094_p8), %s216_s9, 4294967168  ;;  %s730_s23 = sshll.u32 %s1155_s28, 1  ;;  %vm259_vm0 = vcmask 24576   ;;  %v1017_v0 = vmov 0.0   ;;  %v391_v1 = vld [vmem:[%s210_s21] sm:$0xff]  ;;  %v397_v3 = vld [vmem:[%s219_s22] sm:$0xff]  ;;  %v529_v22 = vlaneseq }
  0x3c   : > { %751 = vmatprep.subr.mxu0 %v1017_v0  ;;  %756 = vmatprep.subr.mxu1 %v1017_v0  ;;  %s1173_s4 = scalar_lea.vmem [#allocation8], %s730_s23  ;;  %v394_v2 = vmul.f32 1.442695, %v391_v1  ;;  %vm1018_vm1 = vmmov 0   ;;  %v393_v4 = vadd.f32 1.0, %v391_v1  ;;  %vm392_vm2 = vcmp.gt.f32.partialorder %v391_v1, 0.0 }
  0x3d   : > { %260 = vst.msk [vmem:[%s1173_s4] sm:$0x1] %vm259_vm0, %v1017_v0  ;;  %261 = vst.msk [vmem:[%s1173_s4 + $0x1] sm:$0x1] %vm259_vm0, %v1017_v0  ;;  %752 = vmatpush3.msra.mxu0 %v397_v3  ;;  %753 = vmatprep.mubr.msk.f32.mxu0 %vm1018_vm1, %v1017_v0  ;;  %vm380_vm3 = vcmask 31744   ;;  %s1019_s24 = smov 124  }
  0x3e   : > { %841 = vpow2.f32 %v394_v2  ;;  %758 = vmatprep.mubr.msk.f32.mxu1 %vm1018_vm1, %v1017_v0  ;;  %vm517_vm4 = vcmask 64544   ;;  %vm256_vm5 = vcmask 27648   ;;  %v1020_v23 = vmov 1966171168   ;;  %s1185_s5 = scalar_lea.vmem [#allocation7], %s1158_s29  ;;  %s746_s7 = sshll.u32 %s1005_s15, 5 }
  0x3f   : > { %v527_v24 = vunpack.c.l.s4 %v1020_v23  ;;  %257 = vst.msk [vmem:[%s1185_s5] sm:$0xf] %vm256_vm5, %v1017_v0  ;;  %258 = vst.msk [vmem:[%s1185_s5 + $0x4] sm:$0xf] %vm256_vm5, %v1017_v0  ;;  %v530_v26 = vshrl.u32 %v529_v22, 7  ;;  %vm302_vm6 = vcmask 64512   ;;  %s1200_s6 = scalar_lea.hbm %s1291_s3, %s746_s7 }
  0x40   : > { %s580_s11 = sshll.u32 %s1173_s4, 4  ;;  %s551_s8 = scalar_lea.sflag [#allocation9], %s1155_s28  ;;  %s1202_s11 = int_to_ptr.vmem [resolvable:$true] %s580_s11 }
  0x41   : > { %v528_v28 = vunpack.c.0.s8 %v527_v24  ;;  %s899_s10 = scalar_lea.vmem %s1202_s11, 32  ;;  %s1021_s29 = smov [#allocation8]  }
  0x42   : > { %p900_p8 = scmp.ne.s32.totalorder %s1202_s11, %s899_s10  ;;  %s903_s30 = sshll.u32 %s1021_s29, 4  ;;  %s904_s30 = int_to_ptr.vmem [resolvable:$false] %s903_s30 }
  0x43   : > { %v531_v29 = vsub.s32 %v528_v28, %v530_v26  ;;  %s905_s21 = scalar_lea.vmem %s904_s30, 64  ;;  %p906_p13 = scmp.lt.s32.totalorder %s1202_s11, %s904_s30 }
  0x44   : > { %v379_v13 = vld [vmem:[%s1173_s4] sm:$0x1]  ;;  %v735_v34 = vld [vmem:[%s1173_s4 + $0x1] sm:$0x1]  ;;  %p901_p0 = pnand %p900_p8, %p1098_p9  ;;  %p907_p5 = scmp.lt.s32.totalorder %s905_s21, %s899_s10 }
  0x46   : > { %p902_p3 = pneg %p901_p0  ;;  %p908_p12 = por %p907_p5, %p906_p13 }
  0x48   : > { %p909_p6 = pnand %p908_p12, %p902_p3 }
  0x4b   : > { %v842_v5 = vpop.eup %841 }
  0x4c   : > { %v396_v6 = vsel %vm392_vm2, %v393_v4, %v842_v5 }
  0x4d   : > { %401 = vrot.lane.b32.xlu0 %v396_v6, %s1019_s24  ;;  %270 = vxpose.xlu1.b32.start.end [1/1] (short) (narrow) %v396_v6, 8  ;;  %v381_v7 = vsel %vm380_vm3, %v396_v6, 0.0  ;;  %v518_v16 = vsel %vm517_vm4, %v396_v6, 0.0 }
  0x4e   : > { %v382_v8 = vrot.slane %v381_v7, 4  ;;  %v519_v17 = vrot.slane %v518_v16, 4 }
  0x50   : > { %v383_v9 = vadd.f32 %v382_v8, %v381_v7  ;;  %v520_v18 = vadd.f32 %v519_v17, %v518_v16 }
  0x51   : > { %437 = vrot.lane.b32.xlu0 %v397_v3, %s1019_s24 }
  0x52   : > { %v384_v10 = vrot.slane %v383_v9, 2  ;;  %v521_v19 = vrot.slane %v520_v18, 2 }
  0x54   : > { %v385_v11 = vadd.f32 %v384_v10, %v383_v9  ;;  %v522_v20 = vadd.f32 %v521_v19, %v520_v18 }
  0x56   : > { %v386_v12 = vrot.slane %v385_v11, 1  ;;  %v523_v21 = vrot.slane %v522_v20, 1 }
  0x58   : > { %v387_v14 = vadd.f32 %v386_v12, %v385_v11  ;;  %v524_v27 = vadd.f32 %v523_v21, %v522_v20 }
  0x5a   : > { %v388_v15 = vadd.f32 %v387_v14, %v379_v13  ;;  %v532_v31 = vrot.slane %v524_v27, %v531_v29 }
  0x5c   : > { %390 = vst.msk [vmem:[%s1173_s4] sm:$0x1] %vm259_vm0, %v388_v15  ;;  %v539_v32 = vrot.slane %v532_v31, %v531_v29 }
  0x5e   : > { %540 = vrot.lane.b32.xlu0 %v539_v32, %s1019_s24 }
  0xbf   : > { %v402_v25 = vpop.permute.xlu0 %401 }
  0xc0   : > { %404 = vxpose.xlu1.b32.start.end [1/1] (short) (narrow) %v402_v25, 8 }
  0xc3   : > { %v438_v30 = vpop.permute.xlu0 %437 }
  0xc4   : > { %757 = vmatpush3.msra.mxu1 %v438_v30 }
  0xc9   : > { %v286_v33 = vpop.trf.xlu1 }
  0xca   : > { %754 = vmatmul.mubr.msk.f32.vlgmr.msra.gmra.mxu0 %vm302_vm6, %v286_v33 }
  0xd0   : > { %v541_v35 = vpop.permute.xlu0 %540 }
  0xd1   : > { %v543_v36 = vadd.f32 %v735_v34, %v541_v35 }
  0xd3   : > { %736 = vst.msk [vmem:[%s1173_s4 + $0x1] sm:$0x1] %vm259_vm0, %v543_v36 }
 0x13c   : > { %v420_v37 = vpop.trf.xlu1 }
 0x13d   : > { %759 = vmatmul.mubr.msk.f32.vlgmr.msra.gmra.mxu1 %vm302_vm6, %v420_v37 }
 0x13e   : > { %912 = shalt.err (!%p909_p6)
}
 0x13f   : > { %s913_s9 = scalar_lea.hbm %s1200_s6, 32  ;;  %s917_s4 = scalar_lea.hbm %s1291_s3, 64 }
 0x140   : > { %p914_p7 = scmp.ne.s32.totalorder %s1200_s6, %s913_s9  ;;  %p918_p4 = scmp.lt.s32.totalorder %s1200_s6, %s1291_s3 }
 0x141   : > { %p919_p10 = scmp.lt.s32.totalorder %s917_s4, %s913_s9 }
 0x142   : > { %p915_p1 = pnand %p914_p7, %p1098_p9 }
 0x143   : > { %p920_p8 = por %p919_p10, %p918_p4 }
 0x144   : > { %p916_p2 = pneg %p915_p1 }
 0x146   : > { %p921_p0 = pnand %p920_p8, %p916_p2 }
 0x148   : > { %924 = shalt.err (!%p921_p0)
}
 0x149   : > { %s1022_s18 = smov 16   ;;  %s1023_s19 = smov 1   ;;  %v269_v38 = vld [vmem:[%s1185_s5] sm:$0xf]  ;;  %v732_v42 = vld [vmem:[%s1185_s5 + $0x4] sm:$0xf] }
 0x14a   : > { %766 = dma.vmem_to_hbm [thread:$0]  (%p1098_p9), %s1202_s11, 32, %s1200_s6, %s551_s8, %s1022_s18, %s1022_s18, %s1023_s19  }
 0x14b   : > { %s745_s10 = sshll.u32 %s1005_s15, 7  ;;  %s564_s29 = sshll.u32 %s1185_s5, 4  ;;  %s1238_s29 = int_to_ptr.vmem [resolvable:$true] %s564_s29 }
 0x14c   : > { %s1236_s9 = scalar_lea.hbm %s1290_s2, %s745_s10  ;;  %s546_s11 = scalar_lea.sflag [#allocation4], %s1155_s28 }
 0x14d   : > { %s925_s6 = scalar_lea.vmem %s1238_s29, 128  ;;  %s1024_s15 = smov [#allocation7]  }
 0x14e   : > { %p926_p3 = scmp.ne.s32.totalorder %s1238_s29, %s925_s6  ;;  %s929_s8 = sshll.u32 %s1024_s15, 4  ;;  %s930_s8 = int_to_ptr.vmem [resolvable:$false] %s929_s8 }
 0x14f   : > { %s931_s22 = scalar_lea.vmem %s930_s8, 256  ;;  %p932_p12 = scmp.lt.s32.totalorder %s1238_s29, %s930_s8 }
 0x150   : > { %p927_p13 = pnand %p926_p3, %p1098_p9  ;;  %p933_p6 = scmp.lt.s32.totalorder %s931_s22, %s925_s6 }
 0x152   : > { %p928_p5 = pneg %p927_p13  ;;  %p934_p7 = por %p933_p6, %p932_p12 }
 0x154   : > { %p935_p1 = pnand %p934_p7, %p928_p5 }
 0x18a   : > { %v372_v39 = vpop.f32.mrf.mxu0 }
 0x18b   : > { %v376_v40 = vadd.f32 %v372_v39, %v269_v38 }
 0x18c   : > { %v755_v41 = vpop.f32.mrf.mxu0 }
 0x18d   : > { %378 = vst.msk [vmem:[%s1185_s5] sm:$0xf] %vm256_vm5, %v376_v40 }
 0x1fd   : > { %v509_v43 = vpop.f32.mrf.mxu1 }
 0x1fe   : > { %v513_v44 = vadd.f32 %v732_v42, %v509_v43 }
 0x1ff   : > { %v760_v45 = vpop.f32.mrf.mxu1 }
 0x200   : > { %734 = vst.msk [vmem:[%s1185_s5 + $0x4] sm:$0xf] %vm256_vm5, %v513_v44 }
 0x201   : > { %938 = shalt.err (!%p935_p1)
}
 0x202   : > { %s939_s5 = scalar_lea.hbm %s1236_s9, 128  ;;  %s943_s24 = scalar_lea.hbm %s1290_s2, 256 }
 0x203   : > { %p940_p2 = scmp.ne.s32.totalorder %s1236_s9, %s939_s5  ;;  %p944_p8 = scmp.lt.s32.totalorder %s1236_s9, %s1290_s2 }
 0x204   : > { %p945_p0 = scmp.lt.s32.totalorder %s943_s24, %s939_s5 }
 0x205   : > { %p941_p4 = pnand %p940_p2, %p1098_p9 }
 0x206   : > { %p946_p3 = por %p945_p0, %p944_p8 }
 0x207   : > { %p942_p10 = pneg %p941_p4 }
 0x209   : > { %p947_p13 = pnand %p946_p3, %p942_p10 }
 0x20b   : > { %950 = shalt.err (!%p947_p13)
}
 0x20c   : > { %s1025_s19 = smov 64   ;;  %s1026_s10 = smov 4  }
 0x20d   : > { %765 = dma.vmem_to_hbm [thread:$0]  (%p1098_p9), %s1238_s29, 128, %s1236_s9, %s546_s11, %s1025_s19, %s1025_s19, %s1026_s10  }
 0x20e PF: > { %s595_s30 = sand.u32 1, %s993_s12   ;;  %p1298_p5 = scmp.ge.s32.totalorder %s1013_s17, 2 }
 0x20f   : > { %s596_s21 = scalar_lea.sflag [#allocation4], %s595_s30 }
 0x210   : > { %p777_p12 = pnand %p1298_p5, %p1105_p11 }
 0x212   : > { %p778_p6 = pneg %p777_p12 }
 0x214   : > { %984 = dma.done.wait (%p778_p6), %s596_s21, 128  }
 0x215   : > { %986 = vsyncadd (%p778_p6), %s596_s21, 4294967168  ;;  %s605_s6 = scalar_lea.sflag [#allocation9], %s595_s30 }
 0x216   : > { %988 = dma.done.wait (%p778_p6), %s605_s6, 32  }
 0x217   : > { %990 = vsyncadd (%p778_p6), %s605_s6, 4294967264  ;;  %s26_s17 = sadd.s32 1, %s1013_s17   ;;  %s1299_s12 = smov %s997_s13 }
 0x218   : > { %p23_p7 = scmp.ge.s32.totalorder %s26_s17, 4   ;;  %s1300_s13 = smov %s1001_s14 }
 0x219   : > { %s1301_s14 = smov %s1103_s26  ;;  %s1302_s15 = smov %s1009_s16 }
 0x21a   : > { %s1303_s16 = smov %s1305_s20  ;;  %25 = sbr.rel (!%p23_p7) target bundleno = 10 (0xa), region = 109 }
 0x21f   :  { %610 = vsyncpa [#allocation3], 1 }
 0x220   :  { %612 = vsyncpa [#allocation3 + $0x1], 1 }
 0x221   :  { %613 = vsyncpa [#allocation6], 1 }
 0x222   :  { %615 = vsyncpa [#allocation6 + $0x1], 1 }
 0x223   :  { %616 = vsyncpa [#allocation4], 1 }
 0x224   :  { %618 = vsyncpa [#allocation4 + $0x1], 1 }
 0x225   :  { %619 = vsyncpa [#allocation9], 1 }
 0x226   :  { %621 = vsyncpa [#allocation9 + $0x1], 1 }

</bundles_post_ra>
